<compile_context>
chip_gen: v5e
topology: v5e:2x2
jax: 0.10.0
libtpu: 0.0.40
codegen_flags: <defaults>
</compile_context>

<pallas_src>
import jax
import jax.numpy as jnp
from jax.experimental import pallas as pl
from jax.experimental.pallas import tpu as pltpu

HID = 64            # hidden width of the actor net
LANES = 128         # TPU lane width; everything is padded lane-dense to this
PARAM_ROWS = 8 + LANES   # rows 0..7: w1/b1/b2 (+pad), rows 8..135: padded w2  -> (136, 128)


# ----------------------------------------------------------------------------- kernel ----
def actor_kernel(x_ref, p_ref, out_ref):
    # x_ref:   (Bt, 4)    batch tile of CartPole states
    # p_ref:   (136, 128) packed parameter slab (resident across the grid)
    # out_ref: (Bt, 128)  lane-dense output; cols 0/1 hold the action probabilities
    x = x_ref[...]                                  # (Bt, 4)

    # ---- Linear(4, 64) + ReLU on the VPU (K=4 would leave the MXU empty) ----
    b1 = p_ref[4:5, :]                              # (1, 128), lanes >= 64 are zero
    h = b1 + x[:, 0:1] * p_ref[0:1, :]
    h = h + x[:, 1:2] * p_ref[1:2, :]
    h = h + x[:, 2:3] * p_ref[2:3, :]
    h = h + x[:, 3:4] * p_ref[3:4, :]
    h = jnp.maximum(h, 0.0)                         # (Bt, 128); lanes >= 64 stay exactly 0

    # ---- Linear(64, 2), padded to 128 output columns -> lane-dense MXU pass ----
    w2 = p_ref[8:, :]                               # (128, 128); rows>=64 and cols>=2 are 0
    b2 = p_ref[5:6, :]                              # (1, 128)
    logits = jnp.dot(h, w2, preferred_element_type=jnp.float32) + b2   # (Bt, 128)

    # ---- Softmax over 2 logits == sigmoid of the logit difference (no XLU max/sum) ----
    d = logits[:, 1:2] - logits[:, 0:1]             # (Bt, 1)
    p1 = 1.0 / (1.0 + jnp.exp(-d))                  # exact; keeps 1e-5 match with reference
    p0 = 1.0 - p1

    # ---- Lane-dense full-width store; wrapper slices the 2 real columns ----
    lane = jax.lax.broadcasted_iota(jnp.int32, out_ref.shape, 1)
    out_ref[...] = jnp.where(lane == 0, p0, jnp.where(lane == 1, p1, 0.0))


# --------------------------------------------------------------------------- wrappers ----
def _round_up(n, m):
    return ((n + m - 1) // m) * m


def pack_actor_params(w1, b1, w2, b2):
    """Pack (w1:(4,64), b1:(64,), w2:(64,2), b2:(2,)) into one (136,128) f32 slab."""
    slab = jnp.zeros((PARAM_ROWS, LANES), jnp.float32)
    slab = slab.at[0:4, 0:HID].set(w1.astype(jnp.float32))      # rows 0..3 : w1
    slab = slab.at[4, 0:HID].set(b1.astype(jnp.float32))        # row  4    : b1
    slab = slab.at[5, 0:2].set(b2.astype(jnp.float32))          # row  5    : b2
    slab = slab.at[8:8 + HID, 0:2].set(w2.astype(jnp.float32))  # rows 8..71: w2 (rest zero)
    return slab


def _pallas_actor(xp, params_slab, bt):
    """xp: (Bp, 4) with Bp a multiple of bt; returns the (Bp, 128) padded probability slab."""
    Bp = xp.shape[0]
    grid = (Bp // bt,)
    return pl.pallas_call(
        actor_kernel,
        out_shape=jax.ShapeDtypeStruct((Bp, LANES), jnp.float32),
        grid_spec=pltpu.PrefetchScalarGridSpec(
            num_scalar_prefetch=0,
            grid=grid,
            in_specs=[
                pl.BlockSpec((bt, 4), lambda i: (i, 0)),                 # batch tile of states
                pl.BlockSpec((PARAM_ROWS, LANES), lambda i: (0, 0)),     # params: one resident block
            ],
            out_specs=pl.BlockSpec((bt, LANES), lambda i: (i, 0)),
        ),
        compiler_params=pltpu.CompilerParams(
            dimension_semantics=("parallel",),   # lets v7x split the batch across its 2 TCs
        ),
    )(xp, params_slab)


@jax.jit
def actor_forward_batch(x, params_slab):
    """x: (B, 4) float32 states -> (B, 2) per-row action probabilities."""
    B = x.shape[0]
    bt = 128 if B >= 128 else _round_up(max(B, 1), 8)
    Bp = _round_up(B, bt)
    xp = x.astype(jnp.float32)
    if Bp != B:
        xp = jnp.pad(xp, ((0, Bp - B), (0, 0)))
    out = _pallas_actor(xp, params_slab, bt)
    return out[:B, :2]


@jax.jit
def actor_forward(x, params_slab):
    """x: (4,) float32 state -> (2,) action probabilities (matches ActorNet.forward)."""
    return actor_forward_batch(x.reshape(1, 4), params_slab).reshape(2)


# TODO(synk): in the full A2C loop, fuse the critic head and action sampling into this same
# pallas_call (shared hidden activation, one launch) and keep the parameter slab resident
# across steps instead of re-DMAing it; only the actor forward pass is implemented here.


def init_actor_params(key):
    """Deterministic init mimicking PyTorch's default Linear init: U(-1/sqrt(fan_in), +)."""
    k1, k2, k3, k4 = jax.random.split(key, 4)
    bound1 = 1.0 / jnp.sqrt(4.0)
    bound2 = 1.0 / jnp.sqrt(64.0)
    w1 = jax.random.uniform(k1, (4, 64), jnp.float32, -bound1, bound1)   # (in, out)
    b1 = jax.random.uniform(k2, (64,), jnp.float32, -bound1, bound1)
    w2 = jax.random.uniform(k3, (64, 2), jnp.float32, -bound2, bound2)   # (in, out)
    b2 = jax.random.uniform(k4, (2,), jnp.float32, -bound2, bound2)
    return w1, b1, w2, b2


def actor_forward_ref(x, w1, b1, w2, b2):
    """Pure-JAX reference of the PyTorch forward pass (per-row softmax over the 2 logits)."""
    h = jnp.maximum(x @ w1 + b1, 0.0)
    logits = h @ w2 + b2
    return jax.nn.softmax(logits, axis=-1)


if __name__ == "__main__":
    key = jax.random.PRNGKey(0)
    pkey, xkey, bkey = jax.random.split(key, 3)
    w1, b1, w2, b2 = init_actor_params(pkey)
    slab = pack_actor_params(w1, b1, w2, b2)

    # Single-sample path: exactly the original ActorNet usage on a (4,) CartPole state.
    x1 = jax.random.normal(xkey, (4,), dtype=jnp.float32)
    p1 = jax.block_until_ready(actor_forward(x1, slab))
    r1 = actor_forward_ref(x1, w1, b1, w2, b2)
    assert p1.shape == (2,)
    assert jnp.allclose(jnp.sum(p1), 1.0, atol=1e-5)
    assert jnp.allclose(p1, r1, atol=1e-5, rtol=1e-5)

    # Batched rollout of states: 2 grid tiles of 128, batch axis "parallel".
    xb = jax.random.normal(bkey, (256, 4), dtype=jnp.float32)
    pb = jax.block_until_ready(actor_forward_batch(xb, slab))
    rb = actor_forward_ref(xb, w1, b1, w2, b2)
    assert pb.shape == (256, 2)
    assert jnp.allclose(jnp.sum(pb, axis=-1), 1.0, atol=1e-5)
    assert jnp.allclose(pb, rb, atol=1e-5, rtol=1e-5)

    print("KERNEL_OK")
</pallas_src>

<mosaic_0001>
module attributes {stable_mosaic.version = 11 : i64} {
  func.func @actor_kernel(%arg0: i32, %arg1: memref<8x4xf32, #tpu.memory_space<vmem>>, %arg2: memref<136x128xf32, #tpu.memory_space<vmem>>, %arg3: memref<8x128xf32, #tpu.memory_space<vmem>>) attributes {dimension_semantics = [#tpu.dimension_semantics<parallel>], iteration_bounds = array<i64: 1>, scalar_prefetch = 0 : i64, scratch_operands = 0 : i64, tpu.core_type = #tpu.core_type<tc>, window_params = [{transform_indices = @transform_0, window_bounds = array<i64: 8, 4>}, {pipeline_mode = #tpu.pipeline_mode<synchronous>, transform_indices = @transform_1, window_bounds = array<i64: 136, 128>}, {transform_indices = @transform_2, window_bounds = array<i64: 8, 128>}]} {
    %c0 = arith.constant 0 : index
    %c0_0 = arith.constant 0 : index
    %0 = vector.load %arg1[%c0, %c0_0] : memref<8x4xf32, #tpu.memory_space<vmem>>, vector<8x4xf32>
    %c4 = arith.constant 4 : index
    %c0_1 = arith.constant 0 : index
    %1 = vector.load %arg2[%c4, %c0_1] : memref<136x128xf32, #tpu.memory_space<vmem>>, vector<1x128xf32>
    %2 = vector.extract_strided_slice %0 {offsets = [0, 0], sizes = [8, 1], strides = [1, 1]} : vector<8x4xf32> to vector<8x1xf32>
    %c0_2 = arith.constant 0 : index
    %c0_3 = arith.constant 0 : index
    %3 = vector.load %arg2[%c0_2, %c0_3] : memref<136x128xf32, #tpu.memory_space<vmem>>, vector<1x128xf32>
    %4 = vector.broadcast %2 : vector<8x1xf32> to vector<8x128xf32>
    %5 = vector.broadcast %3 : vector<1x128xf32> to vector<8x128xf32>
    %6 = arith.mulf %4, %5 : vector<8x128xf32>
    %7 = vector.broadcast %1 : vector<1x128xf32> to vector<8x128xf32>
    %8 = arith.addf %7, %6 : vector<8x128xf32>
    %9 = vector.extract_strided_slice %0 {offsets = [0, 1], sizes = [8, 1], strides = [1, 1]} : vector<8x4xf32> to vector<8x1xf32>
    %c1 = arith.constant 1 : index
    %c0_4 = arith.constant 0 : index
    %10 = vector.load %arg2[%c1, %c0_4] : memref<136x128xf32, #tpu.memory_space<vmem>>, vector<1x128xf32>
    %11 = vector.broadcast %9 : vector<8x1xf32> to vector<8x128xf32>
    %12 = vector.broadcast %10 : vector<1x128xf32> to vector<8x128xf32>
    %13 = arith.mulf %11, %12 : vector<8x128xf32>
    %14 = arith.addf %8, %13 : vector<8x128xf32>
    %15 = vector.extract_strided_slice %0 {offsets = [0, 2], sizes = [8, 1], strides = [1, 1]} : vector<8x4xf32> to vector<8x1xf32>
    %c2 = arith.constant 2 : index
    %c0_5 = arith.constant 0 : index
    %16 = vector.load %arg2[%c2, %c0_5] : memref<136x128xf32, #tpu.memory_space<vmem>>, vector<1x128xf32>
    %17 = vector.broadcast %15 : vector<8x1xf32> to vector<8x128xf32>
    %18 = vector.broadcast %16 : vector<1x128xf32> to vector<8x128xf32>
    %19 = arith.mulf %17, %18 : vector<8x128xf32>
    %20 = arith.addf %14, %19 : vector<8x128xf32>
    %21 = vector.extract_strided_slice %0 {offsets = [0, 3], sizes = [8, 1], strides = [1, 1]} : vector<8x4xf32> to vector<8x1xf32>
    %c3 = arith.constant 3 : index
    %c0_6 = arith.constant 0 : index
    %22 = vector.load %arg2[%c3, %c0_6] : memref<136x128xf32, #tpu.memory_space<vmem>>, vector<1x128xf32>
    %23 = vector.broadcast %21 : vector<8x1xf32> to vector<8x128xf32>
    %24 = vector.broadcast %22 : vector<1x128xf32> to vector<8x128xf32>
    %25 = arith.mulf %23, %24 : vector<8x128xf32>
    %26 = arith.addf %20, %25 : vector<8x128xf32>
    %cst = arith.constant 0.000000e+00 : f32
    %27 = vector.broadcast %cst : f32 to vector<8x128xf32>
    %28 = arith.maximumf %26, %27 : vector<8x128xf32>
    %c8 = arith.constant 8 : index
    %c0_7 = arith.constant 0 : index
    %29 = vector.load %arg2[%c8, %c0_7] : memref<136x128xf32, #tpu.memory_space<vmem>>, vector<128x128xf32>
    %c5 = arith.constant 5 : index
    %c0_8 = arith.constant 0 : index
    %30 = vector.load %arg2[%c5, %c0_8] : memref<136x128xf32, #tpu.memory_space<vmem>>, vector<1x128xf32>
    %cst_9 = arith.constant dense<0.000000e+00> : vector<8x128xf32>
    %31 = tpu.matmul %28, %29, %cst_9 {dimension_numbers = #tpu.dot_dimension_numbers<[1], [0], [0], [1], [0, 0, 1, 1], [], []>} : vector<8x128xf32>, vector<128x128xf32>, vector<8x128xf32> -> vector<8x128xf32>
    %32 = vector.broadcast %30 : vector<1x128xf32> to vector<8x128xf32>
    %33 = arith.addf %31, %32 : vector<8x128xf32>
    %34 = vector.extract_strided_slice %33 {offsets = [0, 1], sizes = [8, 1], strides = [1, 1]} : vector<8x128xf32> to vector<8x1xf32>
    %35 = vector.extract_strided_slice %33 {offsets = [0, 0], sizes = [8, 1], strides = [1, 1]} : vector<8x128xf32> to vector<8x1xf32>
    %36 = arith.subf %34, %35 : vector<8x1xf32>
    %cst_10 = arith.constant 0.000000e+00 : f32
    %37 = vector.broadcast %cst_10 : f32 to vector<8x1xf32>
    %38 = arith.subf %37, %36 : vector<8x1xf32>
    %39 = math.exp %38 : vector<8x1xf32>
    %cst_11 = arith.constant 1.000000e+00 : f32
    %40 = vector.broadcast %cst_11 : f32 to vector<8x1xf32>
    %41 = arith.addf %40, %39 : vector<8x1xf32>
    %cst_12 = arith.constant 1.000000e+00 : f32
    %42 = vector.broadcast %cst_12 : f32 to vector<8x1xf32>
    %43 = arith.divf %42, %41 : vector<8x1xf32>
    %cst_13 = arith.constant 1.000000e+00 : f32
    %44 = vector.broadcast %cst_13 : f32 to vector<8x1xf32>
    %45 = arith.subf %44, %43 : vector<8x1xf32>
    %46 = tpu.iota {dimensions = array<i32: 1>} : vector<8x128xi32>
    %c0_i32 = arith.constant 0 : i32
    %47 = vector.broadcast %c0_i32 : i32 to vector<8x128xi32>
    %48 = arith.cmpi eq, %46, %47 : vector<8x128xi32>
    %c1_i32 = arith.constant 1 : i32
    %49 = vector.broadcast %c1_i32 : i32 to vector<8x128xi32>
    %50 = arith.cmpi eq, %46, %49 : vector<8x128xi32>
    %cst_14 = arith.constant 0.000000e+00 : f32
    %51 = vector.shape_cast %43 : vector<8x1xf32> to vector<8x1xf32>
    %52 = vector.broadcast %51 : vector<8x1xf32> to vector<8x128xf32>
    %53 = vector.broadcast %cst_14 : f32 to vector<8x128xf32>
    %54 = arith.select %50, %52, %53 : vector<8x128xi1>, vector<8x128xf32>
    %55 = vector.shape_cast %45 : vector<8x1xf32> to vector<8x1xf32>
    %56 = vector.broadcast %55 : vector<8x1xf32> to vector<8x128xf32>
    %57 = arith.select %48, %56, %54 : vector<8x128xi1>, vector<8x128xf32>
    %c0_15 = arith.constant 0 : index
    %c0_16 = arith.constant 0 : index
    %58 = vector.load %arg3[%c0_15, %c0_16] : memref<8x128xf32, #tpu.memory_space<vmem>>, vector<8x128xf32>
    tpu.vector_store %arg3[%c0_15, %c0_16], %57 {strides = array<i32>} : memref<8x128xf32, #tpu.memory_space<vmem>>, vector<8x128xf32>,
    return
  }
  func.func @transform_0(%arg0: i32) -> (i32, i32) {
    %c0_i32 = arith.constant 0 : i32
    %c0_i32_0 = arith.constant 0 : i32
    return %arg0, %c0_i32 : i32, i32
  }
  func.func @transform_1(%arg0: i32) -> (i32, i32) {
    %c0_i32 = arith.constant 0 : i32
    %c0_i32_0 = arith.constant 0 : i32
    %c0_i32_1 = arith.constant 0 : i32
    return %c0_i32, %c0_i32_0 : i32, i32
  }
  func.func @transform_2(%arg0: i32) -> (i32, i32) {
    %c0_i32 = arith.constant 0 : i32
    %c0_i32_0 = arith.constant 0 : i32
    return %arg0, %c0_i32 : i32, i32
  }
}

</mosaic_0001>

<bundles_post_ra>
// kernel: actor_forward_batch.1
= control target key start
LH: loop header
LB: loop body
LE: loop exit
PB: predicated region body
PF: predicated region fallthrough
CT: control target
= control target key end

     0   :  { %7 = vsyncpa [#allocation3], 0  ;;  %s199_s12 = smov [#allocation2]   ;;  %s200_s14 = smov 128   ;;  %s231_s0 = inlined_call_operand.vmem [shape: f32[8,4], index: 0, kind: input, shape index: {}]   ;;  %s232_s1 = inlined_call_operand.hbm [shape: f32[136,128], index: 1, kind: input, shape index: {}]   ;;  %s233_s2 = inlined_call_operand.vmem [shape: f32[8,128], index: 2, kind: output, shape index: {}]  }
   0x1   :  { %s14_s11 = sshll.u32 %s232_s1, 4  ;;  %s16_s13 = sshll.u32 %s199_s12, 4  ;;  %s15_s11 = int_to_ptr.hbm [resolvable:$true] %s14_s11  ;;  %s17_s13 = int_to_ptr.vmem [resolvable:$true] %s16_s13 }
   0x2   :  { %s201_s15 = smov 8  }
   0x3   :  { %22 = dma.hbm_to_vmem [thread:$0]  %s15_s11, 2176, %s17_s13, [#allocation3], %s200_s14, %s200_s14, %s201_s15  }
   0x4   :  { %197 = dma.done.wait [#allocation3], 2176  }
   0x5   :  { %198 = vsyncadd [#allocation3], 4294965120  ;;  %v202_v0 = vmov 0   ;;  %v203_v1 = vmov 2   ;;  %v204_v2 = vmov 1   ;;  %v27_v3 = vld [vmem:[%s231_s0] sm:$0xff]  ;;  %v127_v59 = vlaneseq }
   0x6   :  { %157 = vset.pattern.permute.xlu0 %v202_v0  ;;  %159 = vset.pattern.permute.xlu1 %v203_v1  ;;  %v79_v4 = vld [vmem:[#allocation2 + $0x80] sm:$0xff]  ;;  %v78_v5 = vld [vmem:[#allocation2 + $0x78] sm:$0xff]  ;;  %v77_v6 = vld [vmem:[#allocation2 + $0x70] sm:$0xff]  ;;  %v205_v9 = vmov 3   ;;  %s206_s0 = smov 1  }
   0x7   :  { %161 = vset.pattern.permute.xlu2 %v204_v2  ;;  %32 = vperm.xlu0 %157, %v27_v3   ;;  %v76_v7 = vld [vmem:[#allocation2 + $0x68] sm:$0xff]  ;;  %v75_v8 = vld [vmem:[#allocation2 + $0x60] sm:$0xff]  ;;  %v74_v10 = vld [vmem:[#allocation2 + $0x58] sm:$0xff]  ;;  %v128_v60 = vand.u32 127, %v127_v59 }
   0x8   :  { %49 = vperm.xlu1 %159, %v27_v3   ;;  %82 = vmatpush.msra.mxu0 %v79_v4  ;;  %v73_v11 = vld [vmem:[#allocation2 + $0x50] sm:$0xff]  ;;  %v72_v12 = vld [vmem:[#allocation2 + $0x48] sm:$0xff]  ;;  %v71_v13 = vld [vmem:[#allocation2 + $0x40] sm:$0xff] }
   0x9   :  { %v70_v14 = vld [vmem:[#allocation2 + $0x38] sm:$0xff]  ;;  %v69_v15 = vld [vmem:[#allocation2 + $0x30] sm:$0xff]  ;;  %v68_v16 = vld [vmem:[#allocation2 + $0x28] sm:$0xff]  ;;  %vm130_vm4 = vcmp.eq.s32.totalorder %v128_v60, 1  ;;  %vm129_vm5 = vcmp.eq.s32.totalorder %v128_v60, 0 }
   0xa   :  { %83 = vmatpush.msra.mxu0 %v78_v5  ;;  %v67_v17 = vld [vmem:[#allocation2 + $0x20] sm:$0xff]  ;;  %v66_v18 = vld [vmem:[#allocation2 + $0x18] sm:$0xff]  ;;  %v65_v19 = vld [vmem:[#allocation2 + $0x10] sm:$0xff] }
   0xb   :  { %v64_v20 = vld [vmem:[#allocation2 + $0x8] sm:$0xff]  ;;  %v163_v23 = vld [vmem:[#allocation2] ss:$0 sm:$0xff]  ;;  %v164_v24 = vld [vmem:[#allocation2 + $0x4] ss:$0 sm:$0xff] }
   0xc   :  { %84 = vmatpush.msra.mxu0 %v77_v6  ;;  %v166_v26 = vld [vmem:[#allocation2 + $0x1] ss:$0 sm:$0xff]  ;;  %v165_v27 = vld [vmem:[#allocation2 + $0x2] ss:$0 sm:$0xff]  ;;  %v167_v28 = vld [vmem:[#allocation2 + $0x3] ss:$0 sm:$0xff] }
   0xd   :  { %v168_v39 = vld [vmem:[#allocation2 + $0x5] ss:$0 sm:$0xff] }
   0xe   :  { %85 = vmatpush.msra.mxu0 %v76_v7 }
   0xf   :  { %158 = vset.pattern.permute.xlu0 %v204_v2 }
  0x10   :  { %160 = vset.pattern.permute.xlu1 %v205_v9  ;;  %41 = vperm.xlu0 %158, %v27_v3  }
  0x11   :  { %57 = vperm.xlu1 %160, %v27_v3   ;;  %86 = vmatpush.msra.mxu0 %v75_v8 }
  0x13   :  { %87 = vmatpush.msra.mxu0 %v74_v10 }
  0x15   :  { %88 = vmatpush.msra.mxu0 %v73_v11 }
  0x17   :  { %89 = vmatpush.msra.mxu0 %v72_v12 }
  0x19   :  { %162 = vset.pattern.permute.xlu1 %v204_v2  ;;  %90 = vmatpush.msra.mxu0 %v71_v13 }
  0x1b   :  { %91 = vmatpush.msra.mxu0 %v70_v14 }
  0x1d   :  { %92 = vmatpush.msra.mxu0 %v69_v15 }
  0x1f   :  { %93 = vmatpush.msra.mxu0 %v68_v16 }
  0x21   :  { %94 = vmatpush.msra.mxu0 %v67_v17 }
  0x23   :  { %95 = vmatpush.msra.mxu0 %v66_v18 }
  0x25   :  { %96 = vmatpush.msra.mxu0 %v65_v19 }
  0x27   :  { %97 = vmatpush.msra.mxu0 %v64_v20 }
  0x79   :  { %v33_v21 = vpop.permute.xlu0 %32 }
  0x7a   :  { %v50_v22 = vpop.permute.xlu1 %49  ;;  %v36_v25 = vmul.f32 %v163_v23, %v33_v21 }
  0x7b   :  { %v53_v33 = vmul.f32 %v165_v27, %v50_v22 }
  0x7c   :  { %v38_v31 = vadd.f32 %v164_v24, %v36_v25 }
  0x82   :  { %v42_v29 = vpop.permute.xlu0 %41 }
  0x83   :  { %v58_v30 = vpop.permute.xlu1 %57  ;;  %v45_v32 = vmul.f32 %v166_v26, %v42_v29 }
  0x84   :  { %v61_v35 = vmul.f32 %v167_v28, %v58_v30 }
  0x85   :  { %v46_v34 = vadd.f32 %v45_v32, %v38_v31 }
  0x87   :  { %v54_v36 = vadd.f32 %v53_v33, %v46_v34 }
  0x89   :  { %v62_v37 = vadd.f32 %v61_v35, %v54_v36 }
  0x8b   :  { %v63_v38 = vmax.f32 %v62_v37, 0.0 }
  0x8d   :  { %98 = vmatmul.f32.vlgmr.msra.gmra.mxu0 %v63_v38 }
 0x10a   :  { %v99_v40 = vpop.f32.mrf.mxu0 }
 0x10b   :  { %v100_v41 = vadd.f32 %v168_v39, %v99_v40 }
 0x10d   :  { %103 = vrot.lane.b32.xlu2 %v100_v41, %s206_s0 }
 0x167   :  { %v104_v42 = vpop.permute.xlu2 %103 }
 0x168   :  { %v106_v43 = vsub.f32 %v100_v41, %v104_v42 }
 0x16a   :  { %v107_v44 = vsub.f32 0.0, %v106_v43 }
 0x16c   :  { %v108_v45 = vmul.f32 1.442695, %v107_v44 }
 0x16e   :  { %169 = vpow2.f32 %v108_v45 }
 0x174   :  { %v170_v46 = vpop.eup %169 }
 0x175   :  { %v110_v47 = vadd.f32 1.0, %v170_v46 }
 0x177   :  { %171 = vrcp.f32 %v110_v47  ;;  %v122_v51 = vand.u32 2147483648, %v110_v47  ;;  %v120_v53 = vand.u32 2147483647, %v110_v47  ;;  %vm116_vm1 = vweird.f32 %v110_v47 }
 0x179   :  { %v123_v55 = vor.u32 1.1754944e-38, %v122_v51  ;;  %vm121_vm3 = vcmp.eq.f32.partialorder %v120_v53, 8.507059e+37 }
 0x17d   :  { %v172_v48 = vpop.eup %171 }
 0x17e   :  { %v112_v49 = vmul.f32 %v172_v48, %v110_v47  ;;  %vm117_vm0 = vweird.f32 %v172_v48 }
 0x17f   :  { %vm118_vm2 = vmor %vm116_vm1, %vm117_vm0 }
 0x180   :  { %v113_v50 = vsub.f32 1.0, %v112_v49 }
 0x182   :  { %v114_v52 = vmul.f32 %v172_v48, %v113_v50 }
 0x184   :  { %v115_v54 = vadd.f32 %v172_v48, %v114_v52 }
 0x186   :  { %v119_v56 = vsel %vm118_vm2, %v172_v48, %v115_v54 }
 0x187   :  { %v124_v57 = vsel %vm121_vm3, %v123_v55, %v119_v56 }
 0x188   :  { %133 = vperm.xlu2 %161, %v124_v57   ;;  %v126_v58 = vsub.f32 1.0, %v124_v57 }
 0x18a   :  { %139 = vperm.xlu1 %162, %v126_v58  }
 0x1e2   :  { %v134_v61 = vpop.permute.xlu2 %133 }
 0x1e3   :  { %v136_v62 = vsel %vm130_vm4, %v134_v61, 0.0 }
 0x1fc   :  { %v140_v63 = vpop.permute.xlu1 %139 }
 0x1fd   :  { %v142_v0 = vsel %vm129_vm5, %v140_v63, %v136_v62 }
 0x1fe   :  { %143 = vst [vmem:[%s233_s2] sm:$0xff] %v142_v0 }
 0x1ff   :  { %148 = vsyncpa [#allocation3], 1 }

</bundles_post_ra>
